<compile_context>
chip_gen: v7x
topology: tpu7x:2x2x1
jax: 0.10.0
libtpu: 0.0.40
codegen_flags: <defaults>
</compile_context>

<pallas_src>
import math

import jax
import jax.numpy as jnp
import numpy as np
from jax.experimental import pallas as pl
from jax.experimental.pallas import tpu as pltpu


def attention_kernel(enc_ref, dec_ref, mask_ref, wdec_ref, wenc_ref, v_ref,
                     a_ref, ctx_ref):
    """One batch-tile of Luong attention (everything fits in VMEM per tile).

    enc_ref  : (Bt, S, H1)  encoder outputs (f32 or bf16; math is f32)
    dec_ref  : (Bt, H)      decoder hidden
    mask_ref : (Bt, S)      mask, batch-major
    wdec_ref : (H, H)       decoder half of W_h, pre-transposed (y = x @ Wt)
    wenc_ref : (H1, H)      encoder half of W_h, pre-transposed
    v_ref    : (1, H)       scoring vector
    a_ref    : (Bt, S)      attention weights (2-D output)
    ctx_ref  : (Bt, H1)     context vectors   (2-D, sublane/lane-dense output)
    """
    # Keep all elementwise / transcendental math in f32 (v5e has no bf16
    # VPU/EUP); enc may arrive as bf16 purely to halve HBM traffic.
    enc = enc_ref[...].astype(jnp.float32)
    dec = dec_ref[...].astype(jnp.float32)
    mask = mask_ref[...].astype(jnp.float32)
    w_dec = wdec_ref[...]
    w_enc = wenc_ref[...]
    v = v_ref[...]

    Bt, S, H1 = enc.shape
    H = dec.shape[1]

    # Split-W trick:  tanh(cat([H_rep, enc]) @ W^T) == tanh(dec@Wd + enc@We)
    # -> no (Bt,S,H+H1) concat slab, decoder-side MXU work done once (not S x).
    dec_proj = jnp.dot(dec, w_dec, preferred_element_type=jnp.float32)        # (Bt, H)
    enc_proj = jnp.dot(enc.reshape(Bt * S, H1), w_enc,
                       preferred_element_type=jnp.float32).reshape(Bt, S, H)  # (Bt, S, H)
    energy = jnp.tanh(enc_proj + dec_proj[:, None, :])                        # (Bt, S, H)

    # scores = v . energy  : VPU multiply + lane reduce over H.
    scores = jnp.sum(energy * v[0][None, None, :], axis=2)                    # (Bt, S)

    # Fused masked softmax (exact algebra of softmax -> *mask -> renormalize):
    #   a = e*mask / (sum(e*mask) + eps*sum(e)),  e = exp(scores - max)
    m = jnp.max(scores, axis=1, keepdims=True)
    e = jnp.exp(scores - m)
    em = e * mask
    denom = (jnp.sum(em, axis=1, keepdims=True)
             + 1e-10 * jnp.sum(e, axis=1, keepdims=True))
    # EUP approximate reciprocal (free bundle slot next to the VALU work) plus
    # one Newton-Raphson step: divide is off the VALU path but stays bit-close
    # to an exact divide (holds the 1e-5 test tolerance).
    r = pl.reciprocal(denom, approx=True)
    r = r * (2.0 - denom * r)
    a = em * r                                                                # (Bt, S)

    # context = sum_s a[b,s] * enc[b,s,:]  as a VPU broadcast-multiply +
    # sublane reduce.  (The previous M=1 per-batch MXU einsum pushed a nearly
    # empty MXU pass per batch row; this is a handful of VALU/XLU ops and
    # yields the dense 2-D (Bt, H1) output directly.)
    ctx = jnp.sum(a[:, :, None] * enc, axis=1)                                # (Bt, H1)

    a_ref[...] = a.astype(a_ref.dtype)
    ctx_ref[...] = ctx.astype(ctx_ref.dtype)


def prepare_attention_params(w_h_weight, v_param, hidden_size):
    """One-time parameter prep (hoisted out of the per-step forward path):
    split W_h into decoder/encoder halves and pre-transpose for y = x @ Wt."""
    w_dec_t = jnp.transpose(w_h_weight[:, :hidden_size])      # (H, H)
    w_enc_t = jnp.transpose(w_h_weight[:, hidden_size:])      # (H1, H)
    v_row = v_param.reshape(1, -1)                             # (1, H)
    return w_dec_t, w_enc_t, v_row


def _round_up(x, m):
    return ((x + m - 1) // m) * m


def _default_block_b(B):
    # Toy / decode-step batches: one whole-batch block (splitting 2..16 rows
    # across cores gains nothing vs. per-step overhead).
    if B <= 16:
        return B
    # Large batches: big tiles (>=512 rows are needed to approach the HBM
    # roofline; small tiles are pipeline-step-overhead bound), a multiple of 8
    # (sublane), and at least 2 grid blocks so the ("parallel",) grid axis can
    # shard across v7x's 2 TensorCores.  2048 rows keeps the f32 working set
    # around ~12 MiB: comfortably inside v7x's 32 MiB default scoped VMEM /
    # 64 MiB physical VMEM with double-buffering (v5e/v6e have 128 MiB).
    return min(2048, _round_up(pl.cdiv(B, 2), 8))


def attention_forward(encoder_outputs, decoder_hidden, inp_mask,
                      w_dec_t, w_enc_t, v_row, *, block_b=None,
                      mask_batch_major=False):
    """
    encoder_outputs: (B, S, H1)  (f32, or bf16 to halve HBM traffic)
    decoder_hidden : (B, H)      f32
    inp_mask       : (S, B) module convention, or (B, S) if mask_batch_major.
    Returns (a, context) with the PyTorch module's shapes (B,1,S), (B,1,H1).
    """
    B, S, H1 = encoder_outputs.shape
    H = decoder_hidden.shape[1]

    # Module convention is (S, B).  Callers that already hold a batch-major
    # mask should pass mask_batch_major=True and skip this tiny XLA op.
    mask_bt = inp_mask if mask_batch_major else jnp.transpose(inp_mask)   # (B, S)

    if block_b is None:
        block_b = _default_block_b(B)
    block_b = max(1, min(block_b, B))
    # NOTE: when B % block_b != 0 the last block runs tanh/exp on padded
    # garbage rows.  Rows are independent and Pallas clips the writeback, so
    # this is benign by construction -- do not "fix" it.
    grid = (pl.cdiv(B, block_b),)

    # Rough per-step f32 VMEM budget: double-buffered inputs/outputs plus the
    # in-kernel temporaries (enc f32 copy, enc_proj, energy, a*enc product).
    est = 4 * (2 * block_b * S * H1            # enc tile (x2 buffers)
               + 2 * block_b * H               # dec
               + 2 * block_b * S               # mask
               + 2 * (H * H + H1 * H + H)      # weights
               + 2 * block_b * S               # a out
               + 2 * block_b * H1              # ctx out
               + 4 * block_b * S * H1          # temporaries
               + 6 * block_b * S)              # softmax scratch
    vmem_limit = None
    if est > 12 * 1024 * 1024:
        # Raise the scoped-VMEM ceiling for big tiles (v5e default is only
        # 16 MiB) while staying well under v7x's 64 MiB physical VMEM.
        vmem_limit = int(min(max(2 * est, 32 * 1024 * 1024), 48 * 1024 * 1024))

    a2d, ctx2d = pl.pallas_call(
        attention_kernel,
        out_shape=(
            jax.ShapeDtypeStruct((B, S), jnp.float32),
            jax.ShapeDtypeStruct((B, H1), jnp.float32),
        ),
        grid_spec=pltpu.PrefetchScalarGridSpec(
            num_scalar_prefetch=0,
            grid=grid,
            in_specs=[
                pl.BlockSpec((block_b, S, H1), lambda i: (i, 0, 0)),
                pl.BlockSpec((block_b, H), lambda i: (i, 0)),
                pl.BlockSpec((block_b, S), lambda i: (i, 0)),
                pl.BlockSpec((H, H), lambda i: (0, 0)),
                pl.BlockSpec((H1, H), lambda i: (0, 0)),
                pl.BlockSpec((1, H), lambda i: (0, 0)),
            ],
            out_specs=(
                pl.BlockSpec((block_b, S), lambda i: (i, 0)),
                pl.BlockSpec((block_b, H1), lambda i: (i, 0)),
            ),
        ),
        compiler_params=pltpu.CompilerParams(
            dimension_semantics=("parallel",),
            vmem_limit_bytes=vmem_limit),
    )(encoder_outputs, decoder_hidden, mask_bt, w_dec_t, w_enc_t, v_row)

    # Free metadata reshapes: the module's singleton dims.
    return a2d[:, None, :], ctx2d[:, None, :]


def attention_reference(encoder_outputs, decoder_hidden, inp_mask, w_h_weight, v_param):
    """Pure-JAX reference mirroring the PyTorch forward exactly."""
    B, S, H1 = encoder_outputs.shape
    H = decoder_hidden.shape[1]
    h_rep = jnp.broadcast_to(decoder_hidden[:, None, :], (B, S, H))
    cat = jnp.concatenate([h_rep, encoder_outputs], axis=2)
    energy = jnp.tanh(cat @ w_h_weight.T)                          # (B, S, H)
    scores = jnp.einsum("h,bsh->bs", v_param, energy)              # (B, S)
    a = jax.nn.softmax(scores, axis=-1) * inp_mask.T
    a = a / (jnp.sum(a, axis=1, keepdims=True) + 1e-10)
    ctx = jnp.einsum("bs,bsd->bd", a, encoder_outputs)
    return a[:, None, :], ctx[:, None, :]


if __name__ == "__main__":
    # Small shapes consistent with the module.
    B, S = 2, 8
    hidden_size, hidden_size1 = 32, 32   # H (decoder), H1 (encoder)

    key = jax.random.PRNGKey(0)
    k_enc, k_dec, k_mask, k_w, k_v = jax.random.split(key, 5)

    encoder_outputs = jax.random.normal(k_enc, (B, S, hidden_size1), jnp.float32)
    decoder_hidden = jax.random.normal(k_dec, (B, hidden_size), jnp.float32)
    # binary sequence mask, shape (S, B) as in the PyTorch call site
    inp_mask = (jax.random.uniform(k_mask, (S, B)) > 0.25).astype(jnp.float32)

    # Deterministic parameter init (synthetic, not a checkpoint load).
    fan_in = hidden_size + hidden_size1
    bound = 1.0 / math.sqrt(fan_in)
    w_h_weight = jax.random.uniform(
        k_w, (hidden_size, fan_in), jnp.float32, minval=-bound, maxval=bound
    )
    stdv = 1.0 / math.sqrt(hidden_size)
    v_param = stdv * jax.random.normal(k_v, (hidden_size,), jnp.float32)

    # One-time parameter prep (done once, not per forward call).
    w_dec_t, w_enc_t, v_row = prepare_attention_params(w_h_weight, v_param, hidden_size)

    a, ctx = attention_forward(
        encoder_outputs, decoder_hidden, inp_mask, w_dec_t, w_enc_t, v_row
    )
    jax.block_until_ready((a, ctx))

    a_ref, ctx_ref = attention_reference(
        encoder_outputs, decoder_hidden, inp_mask, w_h_weight, v_param
    )
    np.testing.assert_allclose(np.asarray(a), np.asarray(a_ref), rtol=1e-5, atol=1e-5)
    np.testing.assert_allclose(np.asarray(ctx), np.asarray(ctx_ref), rtol=1e-5, atol=1e-5)

    print("KERNEL_OK")
</pallas_src>

<mosaic_0001>
module attributes {stable_mosaic.version = 11 : i64} {
  func.func @attention_kernel(%arg0: i32, %arg1: memref<2x8x32xf32, #tpu.memory_space<vmem>>, %arg2: memref<2x32xf32, #tpu.memory_space<vmem>>, %arg3: memref<2x8xf32, #tpu.memory_space<vmem>>, %arg4: memref<32x32xf32, #tpu.memory_space<vmem>>, %arg5: memref<32x32xf32, #tpu.memory_space<vmem>>, %arg6: memref<1x32xf32, #tpu.memory_space<vmem>>, %arg7: memref<2x8xf32, #tpu.memory_space<vmem>>, %arg8: memref<2x32xf32, #tpu.memory_space<vmem>>) attributes {dimension_semantics = [#tpu.dimension_semantics<parallel>], iteration_bounds = array<i64: 1>, scalar_prefetch = 0 : i64, scratch_operands = 0 : i64, tpu.core_type = #tpu.core_type<tc>, window_params = [{transform_indices = @transform_0, window_bounds = array<i64: 2, 8, 32>}, {transform_indices = @transform_1, window_bounds = array<i64: 2, 32>}, {transform_indices = @transform_2, window_bounds = array<i64: 2, 8>}, {pipeline_mode = #tpu.pipeline_mode<synchronous>, transform_indices = @transform_3, window_bounds = array<i64: 32, 32>}, {pipeline_mode = #tpu.pipeline_mode<synchronous>, transform_indices = @transform_4, window_bounds = array<i64: 32, 32>}, {pipeline_mode = #tpu.pipeline_mode<synchronous>, transform_indices = @transform_5, window_bounds = array<i64: 1, 32>}, {transform_indices = @transform_6, window_bounds = array<i64: 2, 8>}, {transform_indices = @transform_7, window_bounds = array<i64: 2, 32>}]} {
    %c0 = arith.constant 0 : index
    %c0_0 = arith.constant 0 : index
    %c0_1 = arith.constant 0 : index
    %0 = vector.load %arg1[%c0, %c0_0, %c0_1] : memref<2x8x32xf32, #tpu.memory_space<vmem>>, vector<2x8x32xf32>
    %c0_2 = arith.constant 0 : index
    %c0_3 = arith.constant 0 : index
    %1 = vector.load %arg2[%c0_2, %c0_3] : memref<2x32xf32, #tpu.memory_space<vmem>>, vector<2x32xf32>
    %c0_4 = arith.constant 0 : index
    %c0_5 = arith.constant 0 : index
    %2 = vector.load %arg3[%c0_4, %c0_5] : memref<2x8xf32, #tpu.memory_space<vmem>>, vector<2x8xf32>
    %c0_6 = arith.constant 0 : index
    %c0_7 = arith.constant 0 : index
    %3 = vector.load %arg4[%c0_6, %c0_7] : memref<32x32xf32, #tpu.memory_space<vmem>>, vector<32x32xf32>
    %c0_8 = arith.constant 0 : index
    %c0_9 = arith.constant 0 : index
    %4 = vector.load %arg5[%c0_8, %c0_9] : memref<32x32xf32, #tpu.memory_space<vmem>>, vector<32x32xf32>
    %c0_10 = arith.constant 0 : index
    %c0_11 = arith.constant 0 : index
    %5 = vector.load %arg6[%c0_10, %c0_11] : memref<1x32xf32, #tpu.memory_space<vmem>>, vector<1x32xf32>
    %cst = arith.constant dense<0.000000e+00> : vector<2x32xf32>
    %6 = tpu.matmul %1, %3, %cst {dimension_numbers = #tpu.dot_dimension_numbers<[1], [0], [0], [1], [0, 0, 1, 1], [], []>} : vector<2x32xf32>, vector<32x32xf32>, vector<2x32xf32> -> vector<2x32xf32>
    %7 = vector.shape_cast %0 : vector<2x8x32xf32> to vector<16x32xf32>
    %cst_12 = arith.constant dense<0.000000e+00> : vector<16x32xf32>
    %8 = tpu.matmul %7, %4, %cst_12 {dimension_numbers = #tpu.dot_dimension_numbers<[1], [0], [0], [1], [0, 0, 1, 1], [], []>} : vector<16x32xf32>, vector<32x32xf32>, vector<16x32xf32> -> vector<16x32xf32>
    %9 = vector.shape_cast %8 : vector<16x32xf32> to vector<2x8x32xf32>
    %10 = vector.shape_cast %6 : vector<2x32xf32> to vector<2x1x32xf32>
    %11 = vector.broadcast %10 : vector<2x1x32xf32> to vector<2x8x32xf32>
    %12 = arith.addf %9, %11 : vector<2x8x32xf32>
    %13 = math.tanh %12 : vector<2x8x32xf32>
    %14 = vector.shape_cast %5 : vector<1x32xf32> to vector<32xf32>
    %15 = vector.shape_cast %14 : vector<32xf32> to vector<1x1x32xf32>
    %16 = vector.broadcast %15 : vector<1x1x32xf32> to vector<2x8x32xf32>
    %17 = arith.mulf %13, %16 : vector<2x8x32xf32>
    %cst_13 = arith.constant dense<0.000000e+00> : vector<2x8xf32>
    %18 = vector.multi_reduction <add>, %17, %cst_13 [2] : vector<2x8x32xf32> to vector<2x8xf32>
    %cst_14 = arith.constant dense<0xFF800000> : vector<2xf32>
    %19 = vector.multi_reduction <maximumf>, %18, %cst_14 [1] : vector<2x8xf32> to vector<2xf32>
    %20 = vector.shape_cast %19 : vector<2xf32> to vector<2x1xf32>
    %21 = vector.broadcast %20 : vector<2x1xf32> to vector<2x8xf32>
    %22 = arith.subf %18, %21 : vector<2x8xf32>
    %23 = math.exp %22 : vector<2x8xf32>
    %24 = arith.mulf %23, %2 : vector<2x8xf32>
    %cst_15 = arith.constant dense<0.000000e+00> : vector<2xf32>
    %25 = vector.multi_reduction <add>, %24, %cst_15 [1] : vector<2x8xf32> to vector<2xf32>
    %26 = vector.shape_cast %25 : vector<2xf32> to vector<2x1xf32>
    %cst_16 = arith.constant dense<0.000000e+00> : vector<2xf32>
    %27 = vector.multi_reduction <add>, %23, %cst_16 [1] : vector<2x8xf32> to vector<2xf32>
    %28 = vector.shape_cast %27 : vector<2xf32> to vector<2x1xf32>
    %cst_17 = arith.constant 1.000000e-10 : f32
    %29 = vector.broadcast %cst_17 : f32 to vector<2x1xf32>
    %30 = arith.mulf %29, %28 : vector<2x1xf32>
    %31 = arith.addf %26, %30 : vector<2x1xf32>
    %32 = tpu.reciprocal %31 {approx = true} : vector<2x1xf32> -> vector<2x1xf32>
    %33 = arith.mulf %31, %32 : vector<2x1xf32>
    %cst_18 = arith.constant 2.000000e+00 : f32
    %34 = vector.broadcast %cst_18 : f32 to vector<2x1xf32>
    %35 = arith.subf %34, %33 : vector<2x1xf32>
    %36 = arith.mulf %32, %35 : vector<2x1xf32>
    %37 = vector.broadcast %36 : vector<2x1xf32> to vector<2x8xf32>
    %38 = arith.mulf %24, %37 : vector<2x8xf32>
    %39 = vector.shape_cast %38 : vector<2x8xf32> to vector<2x8x1xf32>
    %40 = vector.broadcast %39 : vector<2x8x1xf32> to vector<2x8x32xf32>
    %41 = arith.mulf %40, %0 : vector<2x8x32xf32>
    %cst_19 = arith.constant dense<0.000000e+00> : vector<2x32xf32>
    %42 = vector.multi_reduction <add>, %41, %cst_19 [1] : vector<2x8x32xf32> to vector<2x32xf32>
    %c0_20 = arith.constant 0 : index
    %c0_21 = arith.constant 0 : index
    %43 = vector.load %arg7[%c0_20, %c0_21] : memref<2x8xf32, #tpu.memory_space<vmem>>, vector<2x8xf32>
    tpu.vector_store %arg7[%c0_20, %c0_21], %38 {strides = array<i32>} : memref<2x8xf32, #tpu.memory_space<vmem>>, vector<2x8xf32>,
    %c0_22 = arith.constant 0 : index
    %c0_23 = arith.constant 0 : index
    %44 = vector.load %arg8[%c0_22, %c0_23] : memref<2x32xf32, #tpu.memory_space<vmem>>, vector<2x32xf32>
    tpu.vector_store %arg8[%c0_22, %c0_23], %42 {strides = array<i32>} : memref<2x32xf32, #tpu.memory_space<vmem>>, vector<2x32xf32>,
    return
  }
  func.func @transform_0(%arg0: i32) -> (i32, i32, i32) {
    %c0_i32 = arith.constant 0 : i32
    %c0_i32_0 = arith.constant 0 : i32
    %c0_i32_1 = arith.constant 0 : i32
    return %arg0, %c0_i32, %c0_i32_0 : i32, i32, i32
  }
  func.func @transform_1(%arg0: i32) -> (i32, i32) {
    %c0_i32 = arith.constant 0 : i32
    %c0_i32_0 = arith.constant 0 : i32
    return %arg0, %c0_i32 : i32, i32
  }
  func.func @transform_2(%arg0: i32) -> (i32, i32) {
    %c0_i32 = arith.constant 0 : i32
    %c0_i32_0 = arith.constant 0 : i32
    return %arg0, %c0_i32 : i32, i32
  }
  func.func @transform_3(%arg0: i32) -> (i32, i32) {
    %c0_i32 = arith.constant 0 : i32
    %c0_i32_0 = arith.constant 0 : i32
    %c0_i32_1 = arith.constant 0 : i32
    return %c0_i32, %c0_i32_0 : i32, i32
  }
  func.func @transform_4(%arg0: i32) -> (i32, i32) {
    %c0_i32 = arith.constant 0 : i32
    %c0_i32_0 = arith.constant 0 : i32
    %c0_i32_1 = arith.constant 0 : i32
    return %c0_i32, %c0_i32_0 : i32, i32
  }
  func.func @transform_5(%arg0: i32) -> (i32, i32) {
    %c0_i32 = arith.constant 0 : i32
    %c0_i32_0 = arith.constant 0 : i32
    %c0_i32_1 = arith.constant 0 : i32
    return %c0_i32, %c0_i32_0 : i32, i32
  }
  func.func @transform_6(%arg0: i32) -> (i32, i32) {
    %c0_i32 = arith.constant 0 : i32
    %c0_i32_0 = arith.constant 0 : i32
    return %arg0, %c0_i32 : i32, i32
  }
  func.func @transform_7(%arg0: i32) -> (i32, i32) {
    %c0_i32 = arith.constant 0 : i32
    %c0_i32_0 = arith.constant 0 : i32
    return %arg0, %c0_i32 : i32, i32
  }
}

</mosaic_0001>

<bundles_post_ra>
// kernel: tpu_custom_call.1
= control target key start
LH: loop header
LB: loop body
LE: loop exit
PB: predicated region body
PF: predicated region fallthrough
CT: control target
= control target key end

     0   :  { %13 = vsyncpa [#allocation3], 0  ;;  %s852_s0 = inlined_call_operand.hbm [shape: f32[2,8,32], index: 0, kind: input, shape index: {}]   ;;  %s853_s1 = inlined_call_operand.vmem [shape: f32[2,32], index: 1, kind: input, shape index: {}]   ;;  %s854_s2 = inlined_call_operand.vmem [shape: f32[2,8], index: 2, kind: input, shape index: {}]   ;;  %s855_s3 = inlined_call_operand.hbm [shape: f32[32,32], index: 3, kind: input, shape index: {}]   ;;  %s856_s4 = inlined_call_operand.hbm [shape: f32[32,32], index: 4, kind: input, shape index: {}]   ;;  %s857_s5 = inlined_call_operand.vmem [shape: f32[1,32], index: 5, kind: input, shape index: {}]   ;;  %s858_s6 = inlined_call_operand.hbm [shape: f32[2,8], index: 6, kind: output, shape index: {0}]   ;;  %s859_s7 = inlined_call_operand.hbm [shape: f32[2,32], index: 7, kind: output, shape index: {1}]  }
   0x1   :  { %14 = vsyncpa [#allocation6], 0 }
   0x2   :  { %15 = vsyncpa [#allocation4], 0 }
   0x3   :  { %16 = vsyncpa [#allocation10], 0  ;;  %s669_s24 = smov [#allocation5]   ;;  %s670_s26 = smov [#allocation2]  }
   0x4   :  { %s38_s25 = sshll.u32 %s669_s24, 4  ;;  %s22_s27 = sshll.u32 %s670_s26, 4  ;;  %s39_s25 = int_to_ptr.vmem [resolvable:$true] %s38_s25  ;;  %s721_s27 = int_to_ptr.vmem [resolvable:$true] %s22_s27 }
   0x5   :  { %s551_s30 = scalar_lea.hbm %s855_s3, 512 }
   0x6   :  { %p552_p0 = scmp.ne.s32.totalorder %s855_s3, %s551_s30  ;;  %p555_p1 = scmp.lt.u32.totalorder %s551_s30, %s855_s3 }
   0x8   :  { %p557_p2 = pnand %p555_p1, %p552_p0 }
   0xa   :  { %560 = shalt.err (!%p557_p2)
}
   0xb   :  { %s561_s12 = scalar_lea.vmem %s39_s25, 512  ;;  %p566_p4 = scmp.lt.s32.totalorder %s39_s25, %s39_s25 }
   0xc   :  { %p562_p3 = scmp.ne.s32.totalorder %s39_s25, %s561_s12  ;;  %p567_p5 = scmp.lt.s32.totalorder %s561_s12, %s561_s12 }
   0xe   :  { %p568_p6 = por %p567_p5, %p566_p4 }
  0x10   :  { %p569_p7 = pnand %p568_p6, %p562_p3 }
  0x12   :  { %572 = shalt.err (!%p569_p7)
}
  0x13   :  { %s671_s13 = smov 128   ;;  %s672_s14 = smov 8  }
  0x14   :  { %44 = dma.hbm_to_vmem [thread:$0]  %s855_s3, 512, %s39_s25, [#allocation6], %s671_s13, %s671_s13, %s672_s14  }
  0x15   :  { %s573_s19 = scalar_lea.hbm %s852_s0, 256 }
  0x16   :  { %p574_p8 = scmp.ne.s32.totalorder %s852_s0, %s573_s19  ;;  %p577_p9 = scmp.lt.u32.totalorder %s573_s19, %s852_s0 }
  0x18   :  { %p579_p10 = pnand %p577_p9, %p574_p8 }
  0x1a   :  { %582 = shalt.err (!%p579_p10)
}
  0x1b   :  { %s583_s24 = scalar_lea.vmem %s721_s27, 256  ;;  %p588_p12 = scmp.lt.s32.totalorder %s721_s27, %s721_s27 }
  0x1c   :  { %p584_p11 = scmp.ne.s32.totalorder %s721_s27, %s583_s24  ;;  %p589_p13 = scmp.lt.s32.totalorder %s583_s24, %s583_s24 }
  0x1e   :  { %p590_p0 = por %p589_p13, %p588_p12 }
  0x20   :  { %p591_p1 = pnand %p590_p0, %p584_p11 }
  0x22   :  { %594 = shalt.err (!%p591_p1)
}
  0x23   :  { %28 = dma.hbm_to_vmem [thread:$0]  %s852_s0, 256, %s721_s27, [#allocation3], %s671_s13, %s671_s13, %s672_s14  }
  0x24   :  { %s673_s26 = smov [#allocation7]   ;;  %s595_s8 = scalar_lea.hbm %s856_s4, 512 }
  0x25   :  { %s50_s28 = sshll.u32 %s673_s26, 4  ;;  %p596_p2 = scmp.ne.s32.totalorder %s856_s4, %s595_s8  ;;  %s51_s28 = int_to_ptr.vmem [resolvable:$true] %s50_s28 }
  0x26   :  { %p599_p3 = scmp.lt.u32.totalorder %s595_s8, %s856_s4 }
  0x28   :  { %p601_p4 = pnand %p599_p3, %p596_p2 }
  0x2a   :  { %604 = shalt.err (!%p601_p4)
}
  0x2b   :  { %s605_s15 = scalar_lea.vmem %s51_s28, 512  ;;  %p610_p6 = scmp.lt.s32.totalorder %s51_s28, %s51_s28 }
  0x2c   :  { %p606_p5 = scmp.ne.s32.totalorder %s51_s28, %s605_s15  ;;  %p611_p7 = scmp.lt.s32.totalorder %s605_s15, %s605_s15 }
  0x2e   :  { %p612_p8 = por %p611_p7, %p610_p6 }
  0x30   :  { %p613_p9 = pnand %p612_p8, %p606_p5 }
  0x32   :  { %616 = shalt.err (!%p613_p9)
}
  0x33   :  { %56 = dma.hbm_to_vmem [thread:$0]  %s856_s4, 512, %s51_s28, [#allocation6], %s671_s13, %s671_s13, %s672_s14  }
  0x34   :  { %661 = dma.done.wait [#allocation3], 256  }
  0x35   :  { %662 = vsyncadd [#allocation3], 4294967040 }
  0x36   :  { %663 = dma.done.wait [#allocation6], 1024  }
  0x37   :  { %664 = vsyncadd [#allocation6], 4294966272  ;;  %v674_v0 = vmov 0.0|0.0   ;;  %vm675_vm0 = vmmov 0   ;;  %v676_v1 = vmov 0.0   ;;  %v72_v2 = vld [vmem:[#allocation5] sm:$0xff]  ;;  %v240_v19 = vlaneseq }
  0x38   :  { %513 = vmatprep.subr.bf16.mxu0 %v674_v0  ;;  %499 = vmatprep.mubr.msk.f32.mxu0 %vm675_vm0, %v676_v1  ;;  %v73_v3 = vld [vmem:[#allocation5 + $0x8] sm:$0xff]  ;;  %v76_v4 = vld [vmem:[#allocation7] sm:$0xff]  ;;  %v74_v7 = vld [vmem:[#allocation5 + $0x10] sm:$0xff]  ;;  %vm81_vm1 = vcmask 261120   ;;  %v677_v17 = vmov 1966171168  }
  0x39   :  { %v514_v5 = vpack.c.bf16 %v73_v3, %v72_v2  ;;  %v77_v6 = vld [vmem:[#allocation7 + $0x8] sm:$0xff]  ;;  %v75_v8 = vld [vmem:[#allocation5 + $0x18] sm:$0xff]  ;;  %v78_v10 = vld [vmem:[#allocation7 + $0x10] sm:$0xff]  ;;  %v238_v18 = vunpack.c.l.s4 %v677_v17  ;;  %v241_v21 = vshrl.u32 %v240_v19, 7  ;;  %v290_v46 = vand.u32 127, %v240_v19 }
  0x3a   :  { %v519_v9 = vpack.c.bf16 %v77_v6, %v76_v4  ;;  %v79_v11 = vld [vmem:[#allocation7 + $0x18] sm:$0xff]  ;;  %v517_v12 = vpack.c.bf16 %v75_v8, %v74_v7  ;;  %v773_v14 = vld [vmem:[#allocation2] sm:$0xff]  ;;  %vm299_vm2 = vcmask 1041409   ;;  %vm302_vm3 = vcmask 58368  }
  0x3b   :  { %515 = vmatpush3.bf16.msra.mxu0 %v514_v5  ;;  %v523_v13 = vpack.c.bf16 %v79_v11, %v78_v10  ;;  %510 = vmatprep.mubr.msk.f32.mxu1 %vm81_vm1, %v773_v14  ;;  %v70_v15 = vld [vmem:[%s853_s1] sm:$0x3]  ;;  %v780_v16 = vld [vmem:[#allocation2 + $0x8] sm:$0xff]  ;;  %v239_v20 = vunpack.c.0.s8 %v238_v18  ;;  %v785_v26 = vsub.s32 0, %v241_v21  ;;  %v797_v44 = vsub.s32 1, %v241_v21 }
  0x3c   :  { %516 = vmatprep.subr.bf16.mxu0 %v674_v0  ;;  %520 = vmatprep.subr.bf16.mxu1 %v519_v9  ;;  %v479_v36 = vld [vmem:[%s857_s5] ss:$0 sm:$0xff]  ;;  %v800_v48 = vsub.s32 %v290_v46, %v241_v21  ;;  %v678_v55 = vmov 0  }
  0x3d   :  { %522 = vmatpush3.bf16.msra.mxu1 %v519_v9  ;;  %v242_v22 = vsub.s32 %v239_v20, %v241_v21  ;;  %v71_v43 = vld [vmem:[%s854_s2] sm:$0x3]  ;;  %539 = vset.pattern.permute.xlu1 %v678_v55  ;;  %s679_s2 = smov [#allocation8]  }
  0x3e   :  { %524 = vmatprep.subr.bf16.mxu1 %v523_v13  ;;  %v334_v45 = vrot.slane %v71_v43, %v797_v44  ;;  %v327_v54 = vrot.slane %v71_v43, %v785_v26  ;;  %540 = vset.pattern.permute.xlu0 %v678_v55  ;;  %s452_s5 = sshll.u32 %s679_s2, 4  ;;  %s453_s5 = int_to_ptr.vmem [resolvable:$true] %s452_s5 }
  0x3f   :  { %518 = vmatpush3.bf16.msra.mxu0 %v517_v12  ;;  %s617_s18 = scalar_lea.vmem %s453_s5, 32  ;;  %p622_p11 = scmp.lt.s32.totalorder %s453_s5, %s453_s5 }
  0x40   :  { %p618_p10 = scmp.ne.s32.totalorder %s453_s5, %s617_s18  ;;  %p623_p12 = scmp.lt.s32.totalorder %s617_s18, %s617_s18 }
  0x41   :  { %526 = vmatpush3.bf16.msra.mxu1 %v523_v13 }
  0x42   :  { %500 = vmatmul.mubr.msk.f32.vlgmr.msra.gmra.mrb[0].mxu0 %vm81_vm1, %v70_v15  ;;  %p624_p13 = por %p623_p12, %p622_p11 }
  0x44   :  { %511 = vmatmul.mubr.msk.f32.vlgmr.msra.gmra.mrb[0].mxu1 %vm81_vm1, %v780_v16  ;;  %p625_p0 = pnand %p624_p13, %p618_p10 }
 0x115   :  { %v151_v23 = vpop.f32.mrb[0].mxu0 }
 0x116   :  { %v243_v24 = vrot.slane %v151_v23, %v242_v22  ;;  %v501_v25 = vpop.f32.mrb[1].mxu0 }
 0x117   :  { %v512_v27 = vpop.f32.mrb[0].mxu1 }
 0x118   :  { %v244_v28 = vcombine.high %v243_v24, %v243_v24  ;;  %v251_v29 = vrot.slane %v243_v24, %v242_v22  ;;  %v227_v30 = vpop.f32.mrb[1].mxu1 }
 0x11a   :  { %v258_v31 = vrot.slane %v244_v28, %v242_v22  ;;  %v262_v32 = vrot.slane %v251_v29, %v785_v26 }
 0x11c   :  { %v266_v33 = vrot.slane %v258_v31, %v785_v26  ;;  %v269_v34 = vadd.f32 %v262_v32, %v227_v30 }
 0x11e   :  { %v270_v35 = vadd.f32 %v512_v27, %v266_v33  ;;  %541 = vtanh.f32 %v269_v34 }
 0x120   :  { %543 = vtanh.f32 %v270_v35 }
 0x128   :  { %v542_v37 = vpop.eup %541 }
 0x129   :  { %v279_v38 = vmul.f32 %v542_v37, %v479_v36 }
 0x12a   :  { %v544_v39 = vpop.eup %543 }
 0x12b   :  { %v281_v40 = vsel %vm81_vm1, %v279_v38, 0.0  ;;  %v280_v41 = vmul.f32 %v544_v39, %v479_v36 }
 0x12c   :  { %282 = vadd.xlane.f32.xlu0 %v281_v40 }
 0x12d   :  { %v284_v42 = vsel %vm81_vm1, %v280_v41, 0.0 }
 0x130   :  { %285 = vadd.xlane.f32.xlu0 %v284_v42 }
 0x146   :  { %336 = vbcast.lane.b32.xlu0 %v334_v45, 256 }
 0x1b9   :  { %v283_v47 = vpop.xlane.xlu0 %282 }
 0x1ba   :  { %v294_v50 = vrot.slane %v283_v47, %v800_v48 }
 0x1bd   :  { %v286_v49 = vpop.xlane.xlu0 %285 }
 0x1be   :  { %v298_v51 = vrot.slane %v286_v49, %v800_v48 }
 0x1c0   :  { %v300_v52 = vsel %vm299_vm2, %v298_v51, %v294_v50 }
 0x1c1   :  { %v303_v53 = vsel %vm302_vm3, %v300_v52, -inf  ;;  %v337_v63 = vpop.permute.xlu0 %336 }
 0x1c2   :  { %304 = vmax.xlane.f32.xlu1 %v303_v53 }
 0x1d3   :  { %329 = vbcast.lane.b32.xlu1 %v327_v54, 256 }
 0x24f   :  { %v305_v56 = vpop.xlane.xlu1 %304 }
 0x250   :  { %v310_v57 = vrot.slane %v305_v56, %v785_v26  ;;  %v314_v58 = vrot.slane %v305_v56, %v797_v44 }
 0x252   :  { %v317_v59 = vsub.f32 %v283_v47, %v310_v57  ;;  %v318_v60 = vsub.f32 %v286_v49, %v314_v58 }
 0x253   :  { %v330_v3 = vpop.permute.xlu1 %329 }
 0x254   :  { %v319_v61 = vmul.f32 1.442695, %v317_v59  ;;  %v321_v62 = vmul.f32 1.442695, %v318_v60 }
 0x256   :  { %545 = vpow2.f32 %v319_v61 }
 0x257   :  { %547 = vpow2.f32 %v321_v62 }
 0x260   :  { %v546_v0 = vpop.eup %545 }
 0x261   :  { %v548_v1 = vpop.eup %547  ;;  %366 = vperm.xlu1 %539, %v546_v0   ;;  %v340_v4 = vmul.f32 %v546_v0, %v330_v3 }
 0x262   :  { %v341_v2 = vmul.f32 %v548_v1, %v337_v63 }
 0x264   :  { %348 = vperm.xlu0 %540, %v341_v2  }
 0x265   :  { %369 = vperm.xlu1 %539, %v548_v1  }
 0x269   :  { %345 = vperm.xlu1 %539, %v340_v4  }
 0x2e0   :  { %v367_v5 = vpop.permute.xlu1 %366 }
 0x2e1   :  { %v374_v7 = vrot.slane %v367_v5, %v800_v48 }
 0x2e3   :  { %v349_v9 = vpop.permute.xlu0 %348 }
 0x2e4   :  { %v370_v6 = vpop.permute.xlu1 %369  ;;  %v357_v13 = vrot.slane %v349_v9, %v800_v48 }
 0x2e5   :  { %v378_v8 = vrot.slane %v370_v6, %v800_v48 }
 0x2e7   :  { %v379_v10 = vsel %vm299_vm2, %v378_v8, %v374_v7 }
 0x2e8   :  { %v346_v11 = vpop.permute.xlu1 %345  ;;  %v381_v12 = vsel %vm302_vm3, %v379_v10, 0.0 }
 0x2e9   :  { %v353_v15 = vrot.slane %v346_v11, %v800_v48  ;;  %382 = vadd.xlane.f32.xlu1 %v381_v12 }
 0x2eb   :  { %v358_v17 = vsel %vm299_vm2, %v357_v13, %v353_v15 }
 0x2ec   :  { %v360_v18 = vsel %vm302_vm3, %v358_v17, 0.0 }
 0x2ed   :  { %361 = vadd.xlane.f32.xlu0 %v360_v18 }
 0x376   :  { %v383_v19 = vpop.xlane.xlu1 %382 }
 0x377   :  { %v384_v20 = vmul.f32 1e-10, %v383_v19 }
 0x37a   :  { %v362_v21 = vpop.xlane.xlu0 %361 }
 0x37b   :  { %v385_v22 = vadd.f32 %v384_v20, %v362_v21 }
 0x37d   :  { %549 = vrcp.f32 %v385_v22 }
 0x387   :  { %v550_v23 = vpop.eup %549 }
 0x388   :  { %v387_v24 = vmul.f32 %v550_v23, %v385_v22 }
 0x38a   :  { %v388_v25 = vsub.f32 2.0, %v387_v24 }
 0x38c   :  { %v389_v27 = vmul.f32 %v550_v23, %v388_v25 }
 0x38e   :  { %v398_v28 = vrot.slane %v389_v27, %v797_v44  ;;  %v394_v29 = vrot.slane %v389_v27, %v785_v26 }
 0x390   :  { %v402_v30 = vmul.f32 %v398_v28, %v341_v2  ;;  %v401_v31 = vmul.f32 %v394_v29, %v340_v4 }
 0x392   :  { %410 = vperm.xlu1 %539, %v402_v30   ;;  %405 = vperm.xlu0 %540, %v401_v31  }
 0x411   :  { %v411_v32 = vpop.permute.xlu1 %410  ;;  %v406_v33 = vpop.permute.xlu0 %405 }
 0x412   :  { %v414_v34 = vmul.f32 %v411_v32, %v780_v16  ;;  %v436_v35 = vrot.slane %v411_v32, %v800_v48  ;;  %v413_v36 = vmul.f32 %v406_v33, %v773_v14  ;;  %v432_v37 = vrot.slane %v406_v33, %v800_v48 }
 0x414   :  { %v422_v38 = vsel %vm81_vm1, %v414_v34, 0.0  ;;  %v415_v26 = vsel %vm81_vm1, %v413_v36, 0.0  ;;  %v437_v39 = vsel %vm299_vm2, %v436_v35, %v432_v37 }
 0x415   :  { %v423_v40 = vrot.slane %v422_v38, 4  ;;  %v416_v41 = vrot.slane %v415_v26, 4  ;;  %439 = vst.msk [vmem:[#allocation8] sm:$0x3] %vm302_vm3, %v437_v39 }
 0x416   :  { %628 = shalt.err (!%p625_p0)
}
 0x417   :  { %s629_s21 = scalar_lea.hbm %s858_s6, 32 }
 0x418   :  { %p630_p1 = scmp.ne.s32.totalorder %s858_s6, %s629_s21  ;;  %p633_p2 = scmp.lt.u32.totalorder %s629_s21, %s858_s6 }
 0x41a   :  { %p635_p3 = pnand %p633_p2, %p630_p1 }
 0x41c   :  { %638 = shalt.err (!%p635_p3)
}
 0x41d   :  { %455 = dma.vmem_to_hbm [thread:$0]  %s453_s5, 32, %s858_s6, [#allocation4]   ;;  %v424_v14 = vadd.f32 %v423_v40, %v422_v38  ;;  %v417_v16 = vadd.f32 %v416_v41, %v415_v26  ;;  %vm444_vm4 = vcmask 254976  }
 0x41e   :  { %s680_s28 = smov [#allocation9]  }
 0x41f   :  { %v425_v42 = vrot.slane %v424_v14, 2  ;;  %v418_v43 = vrot.slane %v417_v16, 2  ;;  %s462_s29 = sshll.u32 %s680_s28, 4  ;;  %s463_s29 = int_to_ptr.vmem [resolvable:$true] %s462_s29 }
 0x420   :  { %s639_s30 = scalar_lea.vmem %s463_s29, 32  ;;  %p644_p5 = scmp.lt.s32.totalorder %s463_s29, %s463_s29 }
 0x421   :  { %v426_v44 = vadd.f32 %v425_v42, %v424_v14  ;;  %v419_v45 = vadd.f32 %v418_v43, %v417_v16  ;;  %p640_p4 = scmp.ne.s32.totalorder %s463_s29, %s639_s30  ;;  %p645_p6 = scmp.lt.s32.totalorder %s639_s30, %s639_s30 }
 0x423   :  { %v427_v46 = vrot.slane %v426_v44, 1  ;;  %v420_v47 = vrot.slane %v419_v45, 1  ;;  %p646_p7 = por %p645_p6, %p644_p5 }
 0x425   :  { %v428_v48 = vadd.f32 %v427_v46, %v426_v44  ;;  %v421_v49 = vadd.f32 %v420_v47, %v419_v45  ;;  %p647_p8 = pnand %p646_p7, %p640_p4 }
 0x427   :  { %v442_v50 = vsel %vm299_vm2, %v428_v48, %v421_v49 }
 0x428   :  { %445 = vst.msk [vmem:[#allocation9] sm:$0x3] %vm444_vm4, %v442_v50 }
 0x429   :  { %650 = shalt.err (!%p647_p8)
}
 0x42a   :  { %s651_s9 = scalar_lea.hbm %s859_s7, 32 }
 0x42b   :  { %p652_p9 = scmp.ne.s32.totalorder %s859_s7, %s651_s9  ;;  %p655_p10 = scmp.lt.u32.totalorder %s651_s9, %s859_s7 }
 0x42d   :  { %p657_p11 = pnand %p655_p10, %p652_p9 }
 0x42f   :  { %660 = shalt.err (!%p657_p11)
}
 0x430   :  { %465 = dma.vmem_to_hbm [thread:$0]  %s463_s29, 32, %s859_s7, [#allocation10]  }
 0x431   :  { %665 = dma.done.wait [#allocation4], 32  }
 0x432   :  { %666 = vsyncadd [#allocation4], 4294967264 }
 0x433   :  { %667 = dma.done.wait [#allocation10], 32  }
 0x434   :  { %668 = vsyncadd [#allocation10], 4294967264 }
 0x435   :  { %472 = vsyncpa [#allocation3], 1 }
 0x436   :  { %473 = vsyncpa [#allocation6], 1 }
 0x437   :  { %474 = vsyncpa [#allocation4], 1 }
 0x438   :  { %475 = vsyncpa [#allocation10], 1 }

</bundles_post_ra>
